<compile_context>
chip_gen: v6e
topology: v6e:2x2x1
jax: 0.10.0
libtpu: 0.0.40
codegen_flags: <defaults>
</compile_context>

<pallas_src>
import functools

import jax
import jax.numpy as jnp
from jax import lax
from jax.experimental import pallas as pl
from jax.experimental.pallas import tpu as pltpu


def _round_up(x, m):
    return (x + m - 1) // m * m


# ----------------------------- Pallas kernel ------------------------------- #
def _patch_embed_kernel(p_ref, w_ref, pos_ref, o_ref):
    # p_ref:   (TILE_N, K)  im2col patch tile (batch dim squeezed); sequence rows
    #                       0..1 are zero so tile 0 emits the cls/dist token rows.
    # w_ref:   (K, H)       conv weights as a matmul operand (VMEM-resident,
    #                       constant index_map -> fetched once).
    # pos_ref: (TILE_N, H)  position embeddings for this tile; conv bias is folded
    #                       into the patch rows, cls/dist tokens into rows 0..1.
    # o_ref:   (TILE_N, H)  output tile of the final embedding.
    acc = jnp.dot(p_ref[...], w_ref[...], preferred_element_type=jnp.float32)
    o_ref[...] = (acc + pos_ref[...].astype(jnp.float32)).astype(o_ref.dtype)


def _choose_tile_n(nseq, request, batch):
    """Pick the sequence tile size.

    - Full-dim block when the whole sequence fits the request (always legal,
      no (8,128) constraint).
    - When batch == 1, split the sequence so v7x's two TensorCores both get a
      grid point (irrelevant on v5e/v6e, harmless there).
    - Otherwise tile with a multiple of 8 <= request, preferring the candidate
      with the least-wasted ragged last tile (review: avoid mostly-empty tiles).
    """
    request = max(8, request)
    if nseq <= request:
        if batch >= 2 or nseq < 16:
            return nseq
        return _round_up(-(-nseq // 2), 8)
    hi = _round_up(request, 8)
    lo = max(8, (hi // 2 // 8) * 8)
    best_t, best_key = hi, None
    for t in range(hi, lo - 1, -8):
        n_tiles = -(-nseq // t)
        waste = n_tiles * t - nseq
        key = (waste, -t)
        if best_key is None or key < best_key:
            best_t, best_key = t, key
    return best_t


def _pallas_patch_embed(patches, w_mat, pos_full, *, tile_n, out_dtype):
    """patches: (B, Nseq, K) with rows 0..1 zero; w_mat: (K, H);
    pos_full: (Nseq, H) with cls/dist tokens + conv bias folded in.
    Returns the full embedding (B, Nseq, H)."""
    B, Nseq, K = patches.shape
    _, H = w_mat.shape
    tn = _choose_tile_n(Nseq, tile_n, B)
    num_n_tiles = pl.cdiv(Nseq, tn)
    # Batch is the innermost grid axis: the pos tile's block index depends only
    # on `n`, so Pallas revisit detection reuses it across the batch without
    # re-DMA.  (Perf only — changing the grid order stays correct.)
    grid = (num_n_tiles, B)

    cost = pl.CostEstimate(
        flops=2 * B * Nseq * K * H,
        transcendentals=0,
        bytes_accessed=(patches.size * patches.dtype.itemsize
                        + w_mat.size * w_mat.dtype.itemsize
                        + pos_full.size * pos_full.dtype.itemsize
                        + B * Nseq * H * jnp.dtype(out_dtype).itemsize))

    return pl.pallas_call(
        _patch_embed_kernel,
        out_shape=jax.ShapeDtypeStruct((B, Nseq, H), out_dtype),
        grid=grid,
        in_specs=[
            pl.BlockSpec((None, tn, K), lambda n, b: (b, n, 0)),   # patches
            pl.BlockSpec((K, H), lambda n, b: (0, 0)),             # weights
            pl.BlockSpec((tn, H), lambda n, b: (n, 0)),            # pos (+tokens/bias)
        ],
        out_specs=pl.BlockSpec((None, tn, H), lambda n, b: (b, n, 0)),
        compiler_params=pltpu.CompilerParams(
            dimension_semantics=("parallel", "parallel"),
            # Let XLA fuse the im2col transpose/pad/cast into the patches
            # operand so the (B, Nseq, K) array is not materialized in HBM.
            allow_input_fusion=[True, False, False]),
        cost_estimate=cost,
    )(patches, w_mat, pos_full)


# ----------------------- functional forward (jitted) ------------------------ #
def _extract_patches(x_img, Fo, To, pf, pt, sf, st):
    # x_img: (B, F, T) -> (B, Fo*To, pf*pt), row-major over (Fo, To) and (pf, pt).
    B = x_img.shape[0]
    if sf == pf and st == pt:
        # Non-overlapping patches (SSAST default): pure reshape/transpose.
        p = x_img[:, :Fo * pf, :To * pt].reshape(B, Fo, pf, To, pt)
        p = jnp.transpose(p, (0, 1, 3, 2, 4)).reshape(B, Fo * To, pf * pt)
    else:
        # TODO(synk): overlapping strides (AST fstride/tstride=10) still use an
        # XLA gather im2col; an in-kernel windowed DMA / dilated-patches conv
        # would avoid the poor-layout (B,Fo,To,pf,pt) materialization.
        fi = jnp.arange(Fo)[:, None] * sf + jnp.arange(pf)[None, :]   # (Fo, pf)
        ti = jnp.arange(To)[:, None] * st + jnp.arange(pt)[None, :]   # (To, pt)
        p = x_img[:, fi[:, None, :, None], ti[None, :, None, :]]      # (B,Fo,To,pf,pt)
        p = p.reshape(B, Fo * To, pf * pt)
    return p


def ssast_embeddings_forward(params, input_values, *, pf, pt, sf, st, Fo, To,
                             compute_dtype, out_dtype, tile_n):
    H = params["proj_weight"].shape[0]
    K = pf * pt

    # (B, time, freq) -> (B, freq, time): conv spatial dims are (freq, time).
    x_img = jnp.transpose(input_values, (0, 2, 1))
    patches = _extract_patches(x_img, Fo, To, pf, pt, sf, st)         # (B, N, K)
    # Prepend two zero rows: tile 0 of the kernel then emits the cls / dist
    # token rows directly -> no post-kernel concat over the full output.
    patches = jnp.pad(patches, ((0, 0), (2, 0), (0, 0))).astype(compute_dtype)

    # Conv weight (H, 1, pf, pt) -> matmul operand (K, H).  No K padding in HBM.
    w_mat = params["proj_weight"].reshape(H, K).T.astype(compute_dtype)

    pos = params["position_embeddings"][0]                            # (N+2, H)
    tok = jnp.concatenate([params["cls_token"][0],
                           params["distillation_token"][0]], axis=0)  # (2, H)
    # Fold cls/dist into the first two position rows and the conv bias into the
    # patch rows -> single fused add in the kernel, no separate bias operand.
    pos_full = jnp.concatenate(
        [pos[:2] + tok, pos[2:] + params["proj_bias"][None, :]],
        axis=0).astype(compute_dtype)                                  # (N+2, H)

    out = _pallas_patch_embed(patches, w_mat, pos_full,
                              tile_n=tile_n, out_dtype=out_dtype)
    # TODO(synk): nn.Dropout omitted — identity in eval mode; training-mode
    # dropout (random mask) not implemented here.
    return out


# ------------------------------ Module wrapper ------------------------------ #
class SSASTEmbeddingsPallas:
    """JAX/Pallas port of SSASTEmbeddings (eval-mode forward)."""

    def __init__(self, hidden_size, num_mel_bins, max_length,
                 patch_freq_size, patch_time_size,
                 frequency_stride, time_stride, key,
                 compute_dtype=jnp.float32, out_dtype=None, tile_n=512):
        self.hidden_size = hidden_size
        self.pf = patch_freq_size
        self.pt = patch_time_size
        self.sf = frequency_stride
        self.st = time_stride

        self.Fo = (num_mel_bins - self.pf) // self.sf + 1
        self.To = (max_length - self.pt) // self.st + 1
        self.num_patches = self.Fo * self.To

        k_w, k_b, k_cls, k_dist, k_pos = jax.random.split(key, 5)
        # Conv2d(1, H, kernel=(pf, pt)) weight: (H, 1, pf, pt), bias: (H,)
        fan_in = 1 * self.pf * self.pt
        bound = 1.0 / (fan_in ** 0.5)
        self.proj_weight = jax.random.uniform(
            k_w, (hidden_size, 1, self.pf, self.pt),
            minval=-bound, maxval=bound, dtype=jnp.float32)
        self.proj_bias = jax.random.uniform(
            k_b, (hidden_size,), minval=-bound, maxval=bound, dtype=jnp.float32)
        # PyTorch initializes these to zeros; use small random values so the
        # forward pass (and the test) is non-trivial.  Forward semantics unchanged.
        self.cls_token = 0.02 * jax.random.normal(
            k_cls, (1, 1, hidden_size), dtype=jnp.float32)
        self.distillation_token = 0.02 * jax.random.normal(
            k_dist, (1, 1, hidden_size), dtype=jnp.float32)
        self.position_embeddings = 0.02 * jax.random.normal(
            k_pos, (1, self.num_patches + 2, hidden_size), dtype=jnp.float32)

        out_dtype = compute_dtype if out_dtype is None else out_dtype
        self._forward = jax.jit(functools.partial(
            ssast_embeddings_forward,
            pf=self.pf, pt=self.pt, sf=self.sf, st=self.st,
            Fo=self.Fo, To=self.To,
            compute_dtype=compute_dtype, out_dtype=out_dtype, tile_n=tile_n))

    @property
    def params(self):
        return {
            "proj_weight": self.proj_weight,
            "proj_bias": self.proj_bias,
            "cls_token": self.cls_token,
            "distillation_token": self.distillation_token,
            "position_embeddings": self.position_embeddings,
        }

    def __call__(self, input_values):
        return self._forward(self.params, input_values)


# ------------------------------ Reference check ----------------------------- #
def _reference_forward(m, input_values):
    # Pure JAX reference: lax.conv (identical to PyTorch Conv2d) + token concat
    # + position-embedding add.
    x = jnp.transpose(input_values, (0, 2, 1))[:, None, :, :]   # (B, 1, F, T)
    y = lax.conv_general_dilated(
        x, m.proj_weight,
        window_strides=(m.sf, m.st),
        padding="VALID",
        dimension_numbers=("NCHW", "OIHW", "NCHW"),
        precision=lax.Precision.HIGHEST)
    y = y + m.proj_bias[None, :, None, None]
    B, H, Fo, To = y.shape
    patch = jnp.transpose(y.reshape(B, H, Fo * To), (0, 2, 1))  # (B, N, H)
    cls = jnp.broadcast_to(m.cls_token, (B, 1, H))
    dist = jnp.broadcast_to(m.distillation_token, (B, 1, H))
    emb = jnp.concatenate([cls, dist, patch], axis=1) + m.position_embeddings
    return emb


if __name__ == "__main__":
    # Small config consistent with the module: spectrogram time=56, freq=16,
    # 8x8 non-overlapping patches, hidden_size=32 -> N = 2*7 = 14 patches, seq = 16.
    B, T, F = 2, 56, 16
    hidden_size = 32
    pf, pt, sf, st = 8, 8, 8, 8

    key = jax.random.PRNGKey(0)
    k_in, k_params = jax.random.split(key)
    x = jax.random.normal(k_in, (B, T, F), dtype=jnp.float32)

    module = SSASTEmbeddingsPallas(
        hidden_size=hidden_size,
        num_mel_bins=F, max_length=T,
        patch_freq_size=pf, patch_time_size=pt,
        frequency_stride=sf, time_stride=st,
        key=k_params,
        compute_dtype=jnp.float32)   # use jnp.bfloat16 on v6e/v7x to halve HBM streams

    out = jax.block_until_ready(module(x))
    ref = jax.block_until_ready(_reference_forward(module, x))

    assert out.shape == ref.shape, (out.shape, ref.shape)
    assert out.shape == (B, module.num_patches + 2, hidden_size)
    assert jnp.allclose(out, ref, atol=1e-4, rtol=1e-4), "mismatch vs reference"

    print("KERNEL_OK")
</pallas_src>

<mosaic_0001>
module attributes {stable_mosaic.version = 11 : i64} {
  func.func @_patch_embed_kernel(%arg0: i32, %arg1: i32, %arg2: memref<1x16x64xf32, #tpu.memory_space<vmem>>, %arg3: memref<64x32xf32, #tpu.memory_space<vmem>>, %arg4: memref<16x32xf32, #tpu.memory_space<vmem>>, %arg5: memref<1x16x32xf32, #tpu.memory_space<vmem>>) attributes {dimension_semantics = [#tpu.dimension_semantics<parallel>, #tpu.dimension_semantics<parallel>], iteration_bounds = array<i64: 1, 2>, scalar_prefetch = 0 : i64, scratch_operands = 0 : i64, tpu.core_type = #tpu.core_type<tc>, window_params = [{transform_indices = @transform_0, window_bounds = array<i64: 1, 16, 64>}, {pipeline_mode = #tpu.pipeline_mode<synchronous>, transform_indices = @transform_1, window_bounds = array<i64: 64, 32>}, {transform_indices = @transform_2, window_bounds = array<i64: 16, 32>}, {transform_indices = @transform_3, window_bounds = array<i64: 1, 16, 32>}]} {
    %c0 = arith.constant 0 : index
    %c0_0 = arith.constant 0 : index
    %c0_1 = arith.constant 0 : index
    %0 = vector.load %arg2[%c0, %c0_0, %c0_1] : memref<1x16x64xf32, #tpu.memory_space<vmem>>, vector<1x16x64xf32>
    %1 = vector.shape_cast %0 : vector<1x16x64xf32> to vector<16x64xf32>
    %c0_2 = arith.constant 0 : index
    %c0_3 = arith.constant 0 : index
    %2 = vector.load %arg3[%c0_2, %c0_3] : memref<64x32xf32, #tpu.memory_space<vmem>>, vector<64x32xf32>
    %cst = arith.constant dense<0.000000e+00> : vector<16x32xf32>
    %3 = tpu.matmul %1, %2, %cst {dimension_numbers = #tpu.dot_dimension_numbers<[1], [0], [0], [1], [0, 0, 1, 1], [], []>} : vector<16x64xf32>, vector<64x32xf32>, vector<16x32xf32> -> vector<16x32xf32>
    %c0_4 = arith.constant 0 : index
    %c0_5 = arith.constant 0 : index
    %4 = vector.load %arg4[%c0_4, %c0_5] : memref<16x32xf32, #tpu.memory_space<vmem>>, vector<16x32xf32>
    %5 = arith.addf %3, %4 : vector<16x32xf32>
    %c0_6 = arith.constant 0 : index
    %c0_7 = arith.constant 0 : index
    %c0_8 = arith.constant 0 : index
    %6 = vector.load %arg5[%c0_6, %c0_7, %c0_8] : memref<1x16x32xf32, #tpu.memory_space<vmem>>, vector<1x16x32xf32>
    %7 = vector.shape_cast %6 : vector<1x16x32xf32> to vector<16x32xf32>
    %8 = vector.shape_cast %5 : vector<16x32xf32> to vector<1x16x32xf32>
    tpu.vector_store %arg5[%c0_6, %c0_7, %c0_8], %8 {strides = array<i32>} : memref<1x16x32xf32, #tpu.memory_space<vmem>>, vector<1x16x32xf32>,
    return
  }
  func.func @transform_0(%arg0: i32, %arg1: i32) -> (i32, i32, i32) {
    %c0_i32 = arith.constant 0 : i32
    %c0_i32_0 = arith.constant 0 : i32
    return %arg1, %arg0, %c0_i32 : i32, i32, i32
  }
  func.func @transform_1(%arg0: i32, %arg1: i32) -> (i32, i32) {
    %c0_i32 = arith.constant 0 : i32
    %c0_i32_0 = arith.constant 0 : i32
    %c0_i32_1 = arith.constant 0 : i32
    return %c0_i32, %c0_i32_0 : i32, i32
  }
  func.func @transform_2(%arg0: i32, %arg1: i32) -> (i32, i32) {
    %c0_i32 = arith.constant 0 : i32
    %c0_i32_0 = arith.constant 0 : i32
    return %arg0, %c0_i32 : i32, i32
  }
  func.func @transform_3(%arg0: i32, %arg1: i32) -> (i32, i32, i32) {
    %c0_i32 = arith.constant 0 : i32
    %c0_i32_0 = arith.constant 0 : i32
    return %arg1, %arg0, %c0_i32 : i32, i32, i32
  }
}

</mosaic_0001>

<bundles_post_ra>
// kernel: ssast_embeddings_forward.2
= control target key start
LH: loop header
LB: loop body
LE: loop exit
PB: predicated region body
PF: predicated region fallthrough
CT: control target
= control target key end

     0   :  { %s898_s0 = inlined_call_operand.vmem [shape: f32[64,32], index: 0, kind: input, shape index: {}]   ;;  %s899_s1 = inlined_call_operand.vmem [shape: f32[16,32], index: 1, kind: input, shape index: {}]   ;;  %s900_s2 = inlined_call_operand.vmem [shape: f32[2,14,64], index: 2, kind: input, shape index: {}]   ;;  %s901_s3 = inlined_call_operand.<no memory space> [shape: f32[], index: 3, kind: input, shape index: {}]   ;;  %s902_s4 = inlined_call_operand.hbm [shape: f32[2,16,32], index: 4, kind: output, shape index: {}]  }
   0x1   :  { %v748_v0 = vstv %s901_s3 }
   0x2   :  { %10 = vsyncpa [#allocation8], 0 }
   0x3   :  { %12 = vsyncpa [#allocation8 + $0x1], 0  ;;  %s750_s17 = smov 0   ;;  %s752_s18 = smov 0  }
   0x4   :  { %s754_s19 = smov 0   ;;  %s756_s20 = smov 0  }
   0x5   :  { %s758_s21 = smov 0   ;;  %s760_s22 = smov 0  }
   0x6 LB: > { %s534_s3 = sadd.s32 4294967295, %s715_s22   ;;  %s535_s23 = sadd.s32 4294967294, %s715_s22   ;;  %s715_s22 = sphi %s760_s22, %s18_s22   ;;  %s711_s21 = sphi %s758_s21, %s909_s21   ;;  %s707_s20 = sphi %s756_s20, %s908_s20   ;;  %s703_s19 = sphi %s754_s19, %s907_s19   ;;  %s699_s18 = sphi %s752_s18, %s906_s18   ;;  %s695_s17 = sphi %s750_s17, %s905_s17  }
   0x7   : > { %s27_s24 = sadd.s32 1, %s711_s21  ;;  %s114_s25 = sadd.s32 1, %s703_s19 }
   0x8   : > { %p28_p0 = scmp.ge.s32.totalorder %s27_s24, 2  ;;  %p124_p1 = scmp.ne.s32.totalorder %s703_s19, %s699_s18 }
   0x9   : > { %p125_p2 = scmp.eq.s32.totalorder %s534_s3, 1  ;;  %p130_p3 = scmp.ne.s32.totalorder %s699_s18, %s695_s17 }
   0xa   : > { %s911_s24 = smov (%p28_p0, %s27_s24), 0  ;;  %p131_p5 = scmp.eq.s32.totalorder %s535_s23, 1 }
   0xb   : > { %p790_p4 = por %p125_p2, %p124_p1  ;;  %s109_s27 = ssub.s32 %s711_s21, %s911_s24 }
   0xc   : > { %p539_p6 = scmp.ge.s32.totalorder %s715_s22, 1  ;;  %p112_p7 = scmp.eq.s32.totalorder %s109_s27, 0 }
   0xd   : > { %p797_p8 = por %p131_p5, %p130_p3  ;;  %p183_p9 = scmp.lt.s32.totalorder %s715_s22, 3 }
   0xe   : > { %s803_s29 = scalar_select %p112_p7, %s703_s19, %s114_s25  }
   0xf   : > { %p184_p10 = pnand %p539_p6, %p183_p9 }
  0x10   : > { %p226_p11 = scmp.lt.s32.totalorder (!%p184_p10), %s707_s20, 1  ;;  %s552_s16 = sshll.u32 (!%p184_p10), %s707_s20, 8 }
  0x11   : > { %187 = sbr.rel (%p184_p10) target bundleno = 250 (0xfa), region = 32  ;;  %s851_s30 = scalar_lea.hbm (!%p184_p10), %s902_s4, %s552_s16 }
  0x12   : > { %s717_s6 = smov (!%p184_p10), [#allocation7]  }
  0x13   : > { %s643_s7 = sshll.u32 (!%p184_p10), %s717_s6, 4  ;;  %s644_s7 = int_to_ptr.vmem [resolvable:$false] %s643_s7 }
  0x14   : > { %s645_s8 = scalar_lea.vmem (!%p184_p10), %s644_s7, 512 }
  0x16   : > { %v336_v1 = vld [vmem:[%s898_s0 + $0x38] sm:$0xff]  ;;  %v335_v2 = vld [vmem:[%s898_s0 + $0x30] sm:$0xff]  ;;  %v281_v3 = vlaneseq  ;;  %v334_v4 = vld [vmem:[%s898_s0 + $0x28] sm:$0xff]  ;;  %s227_s10 = scalar_select %p226_p11, %s707_s20, 1  ;;  %vm286_vm2 = vcmask 1045504   ;;  %vm339_vm3 = vcmask 523264  }
  0x17   : > { %563 = vmatprep.subr.mxu0 %v336_v1  ;;  %v333_v7 = vld [vmem:[%s898_s0 + $0x20] sm:$0xff]  ;;  %v332_v9 = vld [vmem:[%s898_s0 + $0x18] sm:$0xff]  ;;  %v331_v10 = vld [vmem:[%s898_s0 + $0x10] sm:$0xff]  ;;  %vm421_vm4 = vcmask 261120  }
  0x18   : > { %564 = vmatpush3.msra.mxu0 %v336_v1  ;;  %v282_v5 = vand.u32 127, %v281_v3  ;;  %v310_v6 = vshrl.u32 %v281_v3, 7  ;;  %s541_s13 = sshll.u32 %s227_s10, 1  ;;  %v330_v15 = vld [vmem:[%s898_s0 + $0x8] sm:$0xff]  ;;  %v329_v20 = vld [vmem:[%s898_s0] sm:$0xff]  ;;  %s218_s10 = sand.u32 1, %s699_s18  }
  0x19   : > { %565 = vmatprep.subr.mxu0 %v335_v2  ;;  %s232_s14 = sadd.s32 4294967295, %s541_s13  ;;  %s540_s11 = sshll.u32 %s218_s10, 4  ;;  %v338_v22 = vld [vmem:[%s899_s1 + $0x8] sm:$0xff]  ;;  %v337_v24 = vld [vmem:[%s899_s1] sm:$0xff] }
  0x1a   : > { %566 = vmatpush3.msra.mxu0 %v335_v2  ;;  %v312_v8 = vadd.s32 16, %v310_v6  ;;  %s542_s3 = sshll.u32 %s232_s14, 3  ;;  %vm284_vm0 = vcmp.lt.s32.totalorder %v282_v5, 64  ;;  %s220_s14 = scalar_lea.vmem [#allocation7], %s540_s11 }
  0x1b   : > { %567 = vmatprep.subr.mxu0 %v334_v4  ;;  %s234_s27 = scalar_lea.vmem %s900_s2, %s542_s3  ;;  %s440_s15 = sshll.u32 %s220_s14, 4  ;;  %s846_s15 = int_to_ptr.vmem [resolvable:$true] %s440_s15 }
  0x1c   : > { %568 = vmatpush3.msra.mxu0 %v334_v4  ;;  %vm313_vm1 = vcmp.lt.s32.totalorder %v312_v8, 22  ;;  %v543_v11 = vld [vmem:[%s234_s27 + $0x8] sm:$0xff]  ;;  %v544_v12 = vld [vmem:[%s234_s27 + $0x10] sm:$0xff]  ;;  %s853_s20 = scalar_lea.sflag [#allocation8], %s218_s10  ;;  %s639_s5 = scalar_lea.vmem %s846_s15, 256 }
  0x1d   : > { %569 = vmatprep.subr.mxu0 %v333_v7  ;;  %v285_v13 = vsel %vm284_vm0, %v543_v11, %v748_v0  ;;  %v314_v14 = vsel %vm313_vm1, %v544_v12, %v748_v0  ;;  %p640_p12 = scmp.ne.s32.totalorder %s846_s15, %s639_s5  ;;  %p646_p1 = scmp.lt.s32.totalorder %s846_s15, %s644_s7 }
  0x1e   : > { %570 = vmatpush3.msra.mxu0 %v333_v7  ;;  %v287_v16 = vsel %vm286_vm2, %v285_v13, %v748_v0  ;;  %v319_v17 = vsel %vm284_vm0, %v314_v14, %v748_v0  ;;  %p647_p2 = scmp.lt.s32.totalorder %s645_s8, %s639_s5 }
  0x1f   : > { %571 = vmatprep.subr.mxu0 %v332_v9  ;;  %v288_v18 = vrot.slane %v287_v16, 6  ;;  %v321_v19 = vsel %vm286_vm2, %v319_v17, %v285_v13  ;;  %p641_p13 = pnand %p640_p12, %p790_p4 }
  0x20   : > { %572 = vmatpush3.msra.mxu0 %v332_v9  ;;  %v322_v21 = vrot.slane %v321_v19, 6  ;;  %p648_p3 = por %p647_p2, %p646_p1 }
  0x21   : > { %573 = vmatprep.subr.mxu0 %v331_v10  ;;  %579 = vmatprep.mubr.msk.f32.mxu0 %vm339_vm3, %v288_v18  ;;  %p642_p0 = pneg %p641_p13 }
  0x22   : > { %574 = vmatpush3.msra.mxu0 %v331_v10 }
  0x23   : > { %575 = vmatprep.subr.mxu0 %v330_v15  ;;  %p649_p5 = pnand %p648_p3, %p642_p0 }
  0x24   : > { %576 = vmatpush3.msra.mxu0 %v330_v15 }
  0x25   : > { %577 = vmatprep.subr.mxu0 %v329_v20 }
  0x26   : > { %578 = vmatpush3.msra.mxu0 %v329_v20 }
  0x27   : > { %580 = vmatmul.mubr.msk.f32.vlgmr.msra.gmra.mxu0 %vm339_vm3, %v322_v21 }
  0xe7   : > { %v581_v23 = vpop.f32.mrf.mxu0 }
  0xe8   : > { %v418_v25 = vadd.f32 %v581_v23, %v338_v22 }
  0xe9   : > { %v412_v26 = vpop.f32.mrf.mxu0 }
  0xea   : > { %423 = vst.msk [vmem:[%s220_s14 + $0x8] sm:$0xff] %vm421_vm4, %v418_v25  ;;  %v413_v27 = vadd.f32 %v412_v26, %v337_v24 }
  0xec   : > { %422 = vst.msk [vmem:[%s220_s14] sm:$0xff] %vm421_vm4, %v413_v27 }
  0xed   : > { %652 = shalt.err (!%p649_p5)
}
  0xee   : > { %s653_s9 = scalar_lea.hbm %s851_s30, 256  ;;  %s657_s12 = scalar_lea.hbm %s902_s4, 512 }
  0xef   : > { %p654_p6 = scmp.ne.s32.totalorder %s851_s30, %s653_s9  ;;  %p658_p10 = scmp.lt.s32.totalorder %s851_s30, %s902_s4 }
  0xf0   : > { %p659_p11 = scmp.lt.s32.totalorder %s657_s12, %s653_s9 }
  0xf1   : > { %p655_p7 = pnand %p654_p6, %p790_p4 }
  0xf2   : > { %p660_p12 = por %p659_p11, %p658_p10 }
  0xf3   : > { %p656_p9 = pneg %p655_p7 }
  0xf5   : > { %p661_p13 = pnand %p660_p12, %p656_p9 }
  0xf7   : > { %664 = shalt.err (!%p661_p13)
}
  0xf8   : > { %s718_s16 = smov 128   ;;  %s719_s3 = smov 8  }
  0xf9   : > { %582 = dma.vmem_to_hbm [thread:$0]  (%p790_p4), %s846_s15, 256, %s851_s30, %s853_s20, %s718_s16, %s718_s16, %s719_s3  }
  0xfa PF: > { %p588_p0 = scmp.ge.s32.totalorder %s715_s22, 2  ;;  %s455_s23 = sand.u32 1, %s695_s17  }
  0xfb   : > { %s456_s25 = scalar_lea.sflag [#allocation8], %s455_s23 }
  0xfc   : > { %p585_p1 = pnand %p588_p0, %p797_p8 }
  0xfe   : > { %p586_p2 = pneg %p585_p1 }
 0x100   : > { %690 = dma.done.wait (%p586_p2), %s456_s25, 256  }
 0x101   : > { %692 = vsyncadd (%p586_p2), %s456_s25, 4294967040  ;;  %s18_s22 = sadd.s32 1, %s715_s22   ;;  %s905_s17 = smov %s699_s18 }
 0x102   : > { %p15_p3 = scmp.ge.s32.totalorder %s18_s22, 4   ;;  %s906_s18 = smov %s703_s19 }
 0x103   : > { %s907_s19 = smov %s803_s29  ;;  %s908_s20 = smov %s711_s21 }
 0x104   : > { %s909_s21 = smov %s911_s24  ;;  %17 = sbr.rel (!%p15_p3) target bundleno = 6 (0x6), region = 73 }
 0x109   :  { %461 = vsyncpa [#allocation8], 1 }
 0x10a   :  { %463 = vsyncpa [#allocation8 + $0x1], 1 }

</bundles_post_ra>
